<compile_context>
chip_gen: v7x
topology: tpu7x:2x2x1
jax: 0.10.0
libtpu: 0.0.40
codegen_flags: <defaults>
</compile_context>

<pallas_src>
import jax
import jax.numpy as jnp
from jax import lax
from jax.experimental import pallas as pl
from jax.experimental.pallas import tpu as pltpu


def _mlp_kernel(x_ref, w1_ref, b1_ref, w2_ref, b2_ref, o_ref):
    # x_ref: (TM, Hp) f32 ; w*_ref: (Hp, Hp) bf16 [out, in] ; b*_ref: (1, Hp) f32
    x = x_ref[...]                                   # keep f32 copy for residual
    dims = (((1,), (1,)), ((), ()))                  # contract x.axis1 with w.axis1 (== x @ w.T)

    h = lax.dot_general(x.astype(jnp.bfloat16), w1_ref[...], dims,
                        preferred_element_type=jnp.float32)
    h = jnp.maximum(h + b1_ref[...], 0.0)            # bias + ReLU in f32

    y = lax.dot_general(h.astype(jnp.bfloat16), w2_ref[...], dims,
                        preferred_element_type=jnp.float32)
    y = y + b2_ref[...]

    o_ref[...] = (x + y).astype(o_ref.dtype)         # residual in f32


def _round_up(a, b):
    return (a + b - 1) // b * b


def mlp_pallas(x, w1, b1, w2, b2, *, tm=256):
    """x: [M, H] f32; w1, w2: [H, H] (PyTorch [out, in]); b1, b2: [H]."""
    M, H = x.shape

    # Lane-dense padding: last dim -> multiple of 128, rows -> multiple of 8.
    Hp = _round_up(H, 128)
    Mp = _round_up(M, 8)
    if Mp <= tm:
        TM = Mp
    else:
        TM = tm
        Mp = _round_up(Mp, TM)
    grid_m = Mp // TM

    # Zero-padding keeps semantics exact: padded weight rows/cols and bias
    # entries are zero, so padded output columns are 0 + 0 residual, and
    # padded rows are dead rows sliced off below.  (In real use the bf16 cast
    # + padding of the weights would be hoisted to init time, not per call.)
    x_p = jnp.zeros((Mp, Hp), jnp.float32).at[:M, :H].set(x.astype(jnp.float32))
    w1_p = jnp.zeros((Hp, Hp), jnp.bfloat16).at[:H, :H].set(w1.astype(jnp.bfloat16))
    w2_p = jnp.zeros((Hp, Hp), jnp.bfloat16).at[:H, :H].set(w2.astype(jnp.bfloat16))
    b1_p = jnp.zeros((1, Hp), jnp.float32).at[0, :H].set(b1.astype(jnp.float32))
    b2_p = jnp.zeros((1, Hp), jnp.float32).at[0, :H].set(b2.astype(jnp.float32))

    out_p = pl.pallas_call(
        _mlp_kernel,
        out_shape=jax.ShapeDtypeStruct((Mp, Hp), x.dtype),
        grid_spec=pltpu.PrefetchScalarGridSpec(
            num_scalar_prefetch=0,
            grid=(grid_m,),
            in_specs=[
                pl.BlockSpec((TM, Hp), lambda i: (i, 0)),   # x: tiled over rows
                pl.BlockSpec((Hp, Hp), lambda i: (0, 0)),   # w1: resident in VMEM
                pl.BlockSpec((1, Hp), lambda i: (0, 0)),    # b1: resident
                pl.BlockSpec((Hp, Hp), lambda i: (0, 0)),   # w2: resident
                pl.BlockSpec((1, Hp), lambda i: (0, 0)),    # b2: resident
            ],
            out_specs=pl.BlockSpec((TM, Hp), lambda i: (i, 0)),
        ),
        compiler_params=pltpu.CompilerParams(
            # Row tiles are independent -> parallel (megacore sharding on v7x).
            dimension_semantics=("parallel",),
            # Default scoped VMEM is plenty at these sizes; raise
            # vmem_limit_bytes here when holding large resident weights.
        ),
    )(x_p, w1_p, b1_p, w2_p, b2_p)

    return out_p[:M, :H]


def mlp_ref(x, w1, b1, w2, b2):
    h = jnp.maximum(x @ w1.T + b1, 0.0)
    y = h @ w2.T + b2
    return x + y


if __name__ == "__main__":
    key = jax.random.PRNGKey(0)
    M, H = 8, 32  # seq=8, hidden=32

    k_x, k_w1, k_b1, k_w2, k_b2 = jax.random.split(key, 5)
    bound = 1.0 / (H ** 0.5)
    x = jax.random.normal(k_x, (M, H), dtype=jnp.float32)
    w1 = jax.random.uniform(k_w1, (H, H), minval=-bound, maxval=bound, dtype=jnp.float32)
    b1 = jax.random.uniform(k_b1, (H,), minval=-bound, maxval=bound, dtype=jnp.float32)
    w2 = jax.random.uniform(k_w2, (H, H), minval=-bound, maxval=bound, dtype=jnp.float32)
    b2 = jax.random.uniform(k_b2, (H,), minval=-bound, maxval=bound, dtype=jnp.float32)

    out = mlp_pallas(x, w1, b1, w2, b2)
    jax.block_until_ready(out)

    ref = mlp_ref(x, w1, b1, w2, b2)
    # bf16 MXU operands (f32 accumulation) -> bf16-level tolerance vs f32 ref.
    assert jnp.allclose(out, ref, atol=2e-2, rtol=2e-2), "mismatch vs reference"

    print("KERNEL_OK")
</pallas_src>

<mosaic_0001>
module attributes {stable_mosaic.version = 11 : i64} {
  func.func @_mlp_kernel(%arg0: i32, %arg1: memref<8x128xf32, #tpu.memory_space<vmem>>, %arg2: memref<128x128xbf16, #tpu.memory_space<vmem>>, %arg3: memref<1x128xf32, #tpu.memory_space<vmem>>, %arg4: memref<128x128xbf16, #tpu.memory_space<vmem>>, %arg5: memref<1x128xf32, #tpu.memory_space<vmem>>, %arg6: memref<8x128xf32, #tpu.memory_space<vmem>>) attributes {dimension_semantics = [#tpu.dimension_semantics<parallel>], iteration_bounds = array<i64: 1>, scalar_prefetch = 0 : i64, scratch_operands = 0 : i64, tpu.core_type = #tpu.core_type<tc>, window_params = [{transform_indices = @transform_0, window_bounds = array<i64: 8, 128>}, {pipeline_mode = #tpu.pipeline_mode<synchronous>, transform_indices = @transform_1, window_bounds = array<i64: 128, 128>}, {pipeline_mode = #tpu.pipeline_mode<synchronous>, transform_indices = @transform_2, window_bounds = array<i64: 1, 128>}, {pipeline_mode = #tpu.pipeline_mode<synchronous>, transform_indices = @transform_3, window_bounds = array<i64: 128, 128>}, {pipeline_mode = #tpu.pipeline_mode<synchronous>, transform_indices = @transform_4, window_bounds = array<i64: 1, 128>}, {transform_indices = @transform_5, window_bounds = array<i64: 8, 128>}]} {
    %c0 = arith.constant 0 : index
    %c0_0 = arith.constant 0 : index
    %0 = vector.load %arg1[%c0, %c0_0] : memref<8x128xf32, #tpu.memory_space<vmem>>, vector<8x128xf32>
    %1 = arith.truncf %0 : vector<8x128xf32> to vector<8x128xbf16>
    %c0_1 = arith.constant 0 : index
    %c0_2 = arith.constant 0 : index
    %2 = vector.load %arg2[%c0_1, %c0_2] : memref<128x128xbf16, #tpu.memory_space<vmem>>, vector<128x128xbf16>
    %cst = arith.constant dense<0.000000e+00> : vector<8x128xf32>
    %3 = tpu.matmul %1, %2, %cst {dimension_numbers = #tpu.dot_dimension_numbers<[1], [1], [0], [0], [0, 0, 1, 0], [], []>} : vector<8x128xbf16>, vector<128x128xbf16>, vector<8x128xf32> -> vector<8x128xf32>
    %c0_3 = arith.constant 0 : index
    %c0_4 = arith.constant 0 : index
    %4 = vector.load %arg3[%c0_3, %c0_4] : memref<1x128xf32, #tpu.memory_space<vmem>>, vector<1x128xf32>
    %5 = vector.broadcast %4 : vector<1x128xf32> to vector<8x128xf32>
    %6 = arith.addf %3, %5 : vector<8x128xf32>
    %cst_5 = arith.constant 0.000000e+00 : f32
    %7 = vector.broadcast %cst_5 : f32 to vector<8x128xf32>
    %8 = arith.maximumf %6, %7 : vector<8x128xf32>
    %9 = arith.truncf %8 : vector<8x128xf32> to vector<8x128xbf16>
    %c0_6 = arith.constant 0 : index
    %c0_7 = arith.constant 0 : index
    %10 = vector.load %arg4[%c0_6, %c0_7] : memref<128x128xbf16, #tpu.memory_space<vmem>>, vector<128x128xbf16>
    %cst_8 = arith.constant dense<0.000000e+00> : vector<8x128xf32>
    %11 = tpu.matmul %9, %10, %cst_8 {dimension_numbers = #tpu.dot_dimension_numbers<[1], [1], [0], [0], [0, 0, 1, 0], [], []>} : vector<8x128xbf16>, vector<128x128xbf16>, vector<8x128xf32> -> vector<8x128xf32>
    %c0_9 = arith.constant 0 : index
    %c0_10 = arith.constant 0 : index
    %12 = vector.load %arg5[%c0_9, %c0_10] : memref<1x128xf32, #tpu.memory_space<vmem>>, vector<1x128xf32>
    %13 = vector.broadcast %12 : vector<1x128xf32> to vector<8x128xf32>
    %14 = arith.addf %11, %13 : vector<8x128xf32>
    %15 = arith.addf %0, %14 : vector<8x128xf32>
    %c0_11 = arith.constant 0 : index
    %c0_12 = arith.constant 0 : index
    %16 = vector.load %arg6[%c0_11, %c0_12] : memref<8x128xf32, #tpu.memory_space<vmem>>, vector<8x128xf32>
    tpu.vector_store %arg6[%c0_11, %c0_12], %15 {strides = array<i32>} : memref<8x128xf32, #tpu.memory_space<vmem>>, vector<8x128xf32>,
    return
  }
  func.func @transform_0(%arg0: i32) -> (i32, i32) {
    %c0_i32 = arith.constant 0 : i32
    %c0_i32_0 = arith.constant 0 : i32
    return %arg0, %c0_i32 : i32, i32
  }
  func.func @transform_1(%arg0: i32) -> (i32, i32) {
    %c0_i32 = arith.constant 0 : i32
    %c0_i32_0 = arith.constant 0 : i32
    %c0_i32_1 = arith.constant 0 : i32
    return %c0_i32, %c0_i32_0 : i32, i32
  }
  func.func @transform_2(%arg0: i32) -> (i32, i32) {
    %c0_i32 = arith.constant 0 : i32
    %c0_i32_0 = arith.constant 0 : i32
    %c0_i32_1 = arith.constant 0 : i32
    return %c0_i32, %c0_i32_0 : i32, i32
  }
  func.func @transform_3(%arg0: i32) -> (i32, i32) {
    %c0_i32 = arith.constant 0 : i32
    %c0_i32_0 = arith.constant 0 : i32
    %c0_i32_1 = arith.constant 0 : i32
    return %c0_i32, %c0_i32_0 : i32, i32
  }
  func.func @transform_4(%arg0: i32) -> (i32, i32) {
    %c0_i32 = arith.constant 0 : i32
    %c0_i32_0 = arith.constant 0 : i32
    %c0_i32_1 = arith.constant 0 : i32
    return %c0_i32, %c0_i32_0 : i32, i32
  }
  func.func @transform_5(%arg0: i32) -> (i32, i32) {
    %c0_i32 = arith.constant 0 : i32
    %c0_i32_0 = arith.constant 0 : i32
    return %arg0, %c0_i32 : i32, i32
  }
}

</mosaic_0001>

<bundles_post_ra>
// kernel: tpu_custom_call.1
= control target key start
LH: loop header
LB: loop body
LE: loop exit
PB: predicated region body
PF: predicated region fallthrough
CT: control target
= control target key end

     0   :  { %10 = vsyncpa [#allocation3], 0  ;;  %s597_s0 = inlined_call_operand.hbm [shape: f32[8,128], index: 0, kind: input, shape index: {}]   ;;  %s598_s1 = inlined_call_operand.hbm [shape: bf16[128,128], index: 1, kind: input, shape index: {}]   ;;  %s599_s2 = inlined_call_operand.vmem [shape: f32[1,128], index: 2, kind: input, shape index: {}]   ;;  %s600_s3 = inlined_call_operand.hbm [shape: bf16[128,128], index: 3, kind: input, shape index: {}]   ;;  %s601_s4 = inlined_call_operand.vmem [shape: f32[1,128], index: 4, kind: input, shape index: {}]   ;;  %s602_s5 = inlined_call_operand.hbm [shape: f32[8,128], index: 5, kind: output, shape index: {}]  }
   0x1   :  { %11 = vsyncpa [#allocation6], 0 }
   0x2   :  { %12 = vsyncpa [#allocation4], 0  ;;  %s499_s18 = smov [#allocation5]   ;;  %s405_s22 = scalar_lea.hbm %s598_s1, 1024 }
   0x3   :  { %s28_s19 = sshll.u32 %s499_s18, 4  ;;  %p406_p0 = scmp.ne.s32.totalorder %s598_s1, %s405_s22  ;;  %s29_s19 = int_to_ptr.vmem [resolvable:$true] %s28_s19 }
   0x4   :  { %p409_p1 = scmp.lt.u32.totalorder %s405_s22, %s598_s1 }
   0x6   :  { %p411_p2 = pnand %p409_p1, %p406_p0 }
   0x8   :  { %414 = shalt.err (!%p411_p2)
}
   0x9   :  { %s415_s27 = scalar_lea.vmem %s29_s19, 1024  ;;  %p420_p4 = scmp.lt.s32.totalorder %s29_s19, %s29_s19 }
   0xa   :  { %p416_p3 = scmp.ne.s32.totalorder %s29_s19, %s415_s27  ;;  %p421_p5 = scmp.lt.s32.totalorder %s415_s27, %s415_s27 }
   0xc   :  { %p422_p6 = por %p421_p5, %p420_p4 }
   0xe   :  { %p423_p7 = pnand %p422_p6, %p416_p3 }
  0x10   :  { %426 = shalt.err (!%p423_p7)
}
  0x11   :  { %s500_s28 = smov 64   ;;  %s501_s29 = smov 4  }
  0x12   :  { %34 = dma.hbm_to_vmem [thread:$0]  %s598_s1, 1024, %s29_s19, [#allocation6], %s500_s28, %s500_s28, %s501_s29  }
  0x13   :  { %s502_s7 = smov [#allocation2]   ;;  %s503_s9 = smov [#allocation7]  }
  0x14   :  { %s19_s8 = sshll.u32 %s502_s7, 4  ;;  %s42_s10 = sshll.u32 %s503_s9, 4  ;;  %s20_s8 = int_to_ptr.vmem [resolvable:$true] %s19_s8  ;;  %s43_s10 = int_to_ptr.vmem [resolvable:$true] %s42_s10 }
  0x15   :  { %s427_s13 = scalar_lea.hbm %s597_s0, 128 }
  0x16   :  { %p428_p8 = scmp.ne.s32.totalorder %s597_s0, %s427_s13  ;;  %p431_p9 = scmp.lt.u32.totalorder %s427_s13, %s597_s0 }
  0x18   :  { %p433_p10 = pnand %p431_p9, %p428_p8 }
  0x1a   :  { %436 = shalt.err (!%p433_p10)
}
  0x1b   :  { %s437_s1 = scalar_lea.vmem %s20_s8, 128  ;;  %p442_p12 = scmp.lt.s32.totalorder %s20_s8, %s20_s8 }
  0x1c   :  { %p438_p11 = scmp.ne.s32.totalorder %s20_s8, %s437_s1  ;;  %p443_p13 = scmp.lt.s32.totalorder %s437_s1, %s437_s1 }
  0x1e   :  { %p444_p0 = por %p443_p13, %p442_p12 }
  0x20   :  { %p445_p1 = pnand %p444_p0, %p438_p11 }
  0x22   :  { %448 = shalt.err (!%p445_p1)
}
  0x23   :  { %22 = dma.hbm_to_vmem [thread:$0]  %s597_s0, 128, %s20_s8, [#allocation3]  }
  0x24   :  { %s449_s22 = scalar_lea.hbm %s600_s3, 1024 }
  0x25   :  { %p450_p2 = scmp.ne.s32.totalorder %s600_s3, %s449_s22  ;;  %p453_p3 = scmp.lt.u32.totalorder %s449_s22, %s600_s3 }
  0x27   :  { %p455_p4 = pnand %p453_p3, %p450_p2 }
  0x29   :  { %458 = shalt.err (!%p455_p4)
}
  0x2a   :  { %s459_s27 = scalar_lea.vmem %s43_s10, 1024  ;;  %p464_p6 = scmp.lt.s32.totalorder %s43_s10, %s43_s10 }
  0x2b   :  { %p460_p5 = scmp.ne.s32.totalorder %s43_s10, %s459_s27  ;;  %p465_p7 = scmp.lt.s32.totalorder %s459_s27, %s459_s27 }
  0x2d   :  { %p466_p8 = por %p465_p7, %p464_p6 }
  0x2f   :  { %p467_p9 = pnand %p466_p8, %p460_p5 }
  0x31   :  { %470 = shalt.err (!%p467_p9)
}
  0x32   :  { %48 = dma.hbm_to_vmem [thread:$0]  %s600_s3, 1024, %s43_s10, [#allocation6], %s500_s28, %s500_s28, %s501_s29  }
  0x33   :  { %493 = dma.done.wait [#allocation3], 128  }
  0x34   :  { %494 = vsyncadd [#allocation3], 4294967168 }
  0x35   :  { %495 = dma.done.wait [#allocation6], 2048  }
  0x36   :  { %496 = vsyncadd [#allocation6], 4294965248  ;;  %v504_v0 = vmov 0.0   ;;  %vm505_vm0 = vmmov 0   ;;  %v389_v1 = vld [vmem:[#allocation5] sm:$0xff]   ;;  %v390_v2 = vld [vmem:[#allocation5 + $0x8] sm:$0xff]  }
  0x37   :  { %341 = vmatprep.subr.bf16.mxu0 %v504_v0  ;;  %357 = vmatprep.mubr.msk.bf16.mxu0 %vm505_vm0, %v504_v0  ;;  %v397_v3 = vld [vmem:[#allocation7] sm:$0xff]   ;;  %v391_v4 = vld [vmem:[#allocation5 + $0x10] sm:$0xff]   ;;  %v398_v5 = vld [vmem:[#allocation7 + $0x8] sm:$0xff]   ;;  %s506_s7 = smov [#allocation8]  }
  0x38   :  { %361 = vmatprep.subr.bf16.mxu1 %v504_v0  ;;  %377 = vmatprep.mubr.msk.bf16.mxu1 %vm505_vm0, %v504_v0  ;;  %v392_v6 = vld [vmem:[#allocation5 + $0x18] sm:$0xff]   ;;  %v399_v7 = vld [vmem:[#allocation7 + $0x10] sm:$0xff]   ;;  %v393_v8 = vld [vmem:[#allocation5 + $0x20] sm:$0xff]   ;;  %s295_s8 = sshll.u32 %s506_s7, 4  ;;  %s296_s8 = int_to_ptr.vmem [resolvable:$true] %s295_s8 }
  0x39   :  { %342 = vmatpush3.bf16.xpose.msra.mxu0 %v389_v1  ;;  %362 = vmatpush3.bf16.xpose.msra.mxu1 %v397_v3  ;;  %v400_v9 = vld [vmem:[#allocation7 + $0x18] sm:$0xff]   ;;  %v394_v10 = vld [vmem:[#allocation5 + $0x28] sm:$0xff]   ;;  %v401_v11 = vld [vmem:[#allocation7 + $0x20] sm:$0xff]   ;;  %p476_p11 = scmp.lt.s32.totalorder %s296_s8, %s296_s8 }
  0x3a   :  { %343 = vmatprep.subr.bf16.mxu0 %v504_v0  ;;  %363 = vmatprep.subr.bf16.mxu1 %v504_v0  ;;  %v395_v12 = vld [vmem:[#allocation5 + $0x30] sm:$0xff]   ;;  %v402_v13 = vld [vmem:[#allocation7 + $0x28] sm:$0xff]   ;;  %v396_v14 = vld [vmem:[#allocation5 + $0x38] sm:$0xff]  }
  0x3b   :  { %v403_v15 = vld [vmem:[#allocation7 + $0x30] sm:$0xff]   ;;  %v61_v16 = vld [vmem:[#allocation2] sm:$0xff] }
  0x3c   :  { %v62_v17 = vpack.c.bf16 %v61_v16, %v61_v16  ;;  %v404_v18 = vld [vmem:[#allocation7 + $0x38] sm:$0xff]  }
  0x3d   :  { %v305_v19 = vld [vmem:[%s599_s2] ss:$0 sm:$0xff]  ;;  %s471_s2 = scalar_lea.vmem %s296_s8, 128 }
  0x3e   :  { %v314_v27 = vld [vmem:[%s601_s4] ss:$0 sm:$0xff]  ;;  %p472_p10 = scmp.ne.s32.totalorder %s296_s8, %s471_s2  ;;  %p477_p12 = scmp.lt.s32.totalorder %s471_s2, %s471_s2 }
  0x40   :  { %p478_p13 = por %p477_p12, %p476_p11 }
  0x41   :  { %344 = vmatpush3.bf16.xpose.msra.mxu0 %v390_v2  ;;  %364 = vmatpush3.bf16.xpose.msra.mxu1 %v398_v5 }
  0x42   :  { %345 = vmatprep.subr.bf16.mxu0 %v504_v0  ;;  %365 = vmatprep.subr.bf16.mxu1 %v504_v0  ;;  %p479_p0 = pnand %p478_p13, %p472_p10 }
  0x49   :  { %346 = vmatpush3.bf16.xpose.msra.mxu0 %v391_v4  ;;  %366 = vmatpush3.bf16.xpose.msra.mxu1 %v399_v7 }
  0x4a   :  { %347 = vmatprep.subr.bf16.mxu0 %v504_v0  ;;  %367 = vmatprep.subr.bf16.mxu1 %v504_v0 }
  0x51   :  { %348 = vmatpush3.bf16.xpose.msra.mxu0 %v392_v6  ;;  %368 = vmatpush3.bf16.xpose.msra.mxu1 %v400_v9 }
  0x52   :  { %349 = vmatprep.subr.bf16.mxu0 %v504_v0  ;;  %369 = vmatprep.subr.bf16.mxu1 %v504_v0 }
  0x59   :  { %350 = vmatpush3.bf16.xpose.msra.mxu0 %v393_v8  ;;  %370 = vmatpush3.bf16.xpose.msra.mxu1 %v401_v11 }
  0x5a   :  { %351 = vmatprep.subr.bf16.mxu0 %v504_v0  ;;  %371 = vmatprep.subr.bf16.mxu1 %v504_v0 }
  0x61   :  { %352 = vmatpush3.bf16.xpose.msra.mxu0 %v394_v10  ;;  %372 = vmatpush3.bf16.xpose.msra.mxu1 %v402_v13 }
  0x62   :  { %353 = vmatprep.subr.bf16.mxu0 %v504_v0  ;;  %373 = vmatprep.subr.bf16.mxu1 %v504_v0 }
  0x69   :  { %354 = vmatpush3.bf16.xpose.msra.mxu0 %v395_v12  ;;  %374 = vmatpush3.bf16.xpose.msra.mxu1 %v403_v15 }
  0x6a   :  { %355 = vmatprep.subr.bf16.mxu0 %v504_v0  ;;  %375 = vmatprep.subr.bf16.mxu1 %v504_v0 }
  0x71   :  { %356 = vmatpush3.bf16.xpose.msra.mxu0 %v396_v14  ;;  %376 = vmatpush3.bf16.xpose.msra.mxu1 %v404_v18 }
  0x78   :  { %358 = vmatmul.mubr.bf16.vlgmr.msra.gmra.mrb[0].mxu0 %v62_v17 }
 0x14b   :  { %v168_v20 = vpop.f32.mrb[0].mxu0 }
 0x14c   :  { %v169_v21 = vadd.f32 %v305_v19, %v168_v20  ;;  %v359_v22 = vpop.f32.mrb[1].mxu0 }
 0x14d   :  { %v171_v23 = vpop.f32.mrb[2].mxu0 }
 0x14e   :  { %v174_v24 = vmax.f32 %v169_v21, 0.0  ;;  %v360_v25 = vpop.f32.mrb[3].mxu0 }
 0x150   :  { %v175_v26 = vpack.c.bf16 %v174_v24, %v174_v24 }
 0x152   :  { %378 = vmatmul.mubr.bf16.vlgmr.msra.gmra.mrb[0].mxu1 %v175_v26 }
 0x225   :  { %v281_v28 = vpop.f32.mrb[0].mxu1 }
 0x226   :  { %v282_v29 = vadd.f32 %v314_v27, %v281_v28  ;;  %v379_v30 = vpop.f32.mrb[1].mxu1 }
 0x227   :  { %v284_v31 = vpop.f32.mrb[2].mxu1 }
 0x228   :  { %v287_v32 = vadd.f32 %v282_v29, %v61_v16  ;;  %v380_v33 = vpop.f32.mrb[3].mxu1 }
 0x22a   :  { %288 = vst [vmem:[#allocation8] sm:$0xff] %v287_v32 }
 0x22b   :  { %482 = shalt.err (!%p479_p0)
}
 0x22c   :  { %s483_s4 = scalar_lea.hbm %s602_s5, 128 }
 0x22d   :  { %p484_p1 = scmp.ne.s32.totalorder %s602_s5, %s483_s4  ;;  %p487_p2 = scmp.lt.u32.totalorder %s483_s4, %s602_s5 }
 0x22f   :  { %p489_p3 = pnand %p487_p2, %p484_p1 }
 0x231   :  { %492 = shalt.err (!%p489_p3)
}
 0x232   :  { %298 = dma.vmem_to_hbm [thread:$0]  %s296_s8, 128, %s602_s5, [#allocation4]  }
 0x233   :  { %497 = dma.done.wait [#allocation4], 128  }
 0x234   :  { %498 = vsyncadd [#allocation4], 4294967168 }
 0x235   :  { %302 = vsyncpa [#allocation3], 1 }
 0x236   :  { %303 = vsyncpa [#allocation6], 1 }
 0x237   :  { %304 = vsyncpa [#allocation4], 1 }

</bundles_post_ra>
